<compile_context>
chip_gen: v5e
topology: v5e:2x2
jax: 0.10.0
libtpu: 0.0.40
codegen_flags: <defaults>
</compile_context>

<pallas_src>
import functools

import jax
import jax.numpy as jnp
import numpy as np
from jax import lax
from jax.experimental import pallas as pl
from jax.experimental.pallas import tpu as pltpu

P = 4          # patch size of the patch-embedding conv (kernel == stride == 4)
EPS = 1e-5     # LayerNorm epsilon
LANE = 128
N_CORE_SPLIT = 2   # token-range split for megacore (v7x has 2 TCs/chip)


def _round_up(n, m):
    return ((n + m - 1) // m) * m


def _choose_token_tile(tokens_per_core):
    for cand in (2048, 1024, 512, 256, 128, 64, 32, 16, 8):
        if tokens_per_core % cand == 0:
            return cand
    return tokens_per_core


def extract_patches(x, pd_pad):
    """(B,T,C,H,W) -> (B, T*S, pd_pad) bf16, matching Conv2d(kernel=stride=P).

    Cast to bf16 happens before the transpose (half the bytes moved).  Lane
    C*P*P (=48) is set to 1.0 so the patch-embed bias can live in the matching
    wpe row and ride the MXU for free; remaining pad lanes are zero (exact).
    """
    B, T, C, H, W = x.shape
    pd = C * P * P
    x = x.astype(jnp.bfloat16)
    x = x.reshape(B, T, C, H // P, P, W // P, P)
    x = x.transpose(0, 1, 3, 5, 2, 4, 6)                      # (B,T,Hp,Wp,C,P,P)
    p = x.reshape(B, T * (H // P) * (W // P), pd)              # (B, T*S, 48)
    n_tok = p.shape[1]
    parts = [p, jnp.ones((B, n_tok, 1), jnp.bfloat16)]        # bias lane
    tail = pd_pad - pd - 1
    if tail > 0:
        parts.append(jnp.zeros((B, n_tok, tail), jnp.bfloat16))
    return jnp.concatenate(parts, axis=-1)                    # (B, T*S, pd_pad)


# ---------------------------------------------------------------------------
# Kernel 1: backbone surrogate (patch-embed + LayerNorm) + pooled partial sums
# ---------------------------------------------------------------------------
def backbone_pool_kernel(p_ref, wpe_ref, out_ref, acc_ref):
    s = pl.program_id(2)

    @pl.when(s == 0)
    def _():
        acc_ref[...] = jnp.zeros_like(acc_ref)

    x = p_ref[...]                                     # (tok, PDp) bf16
    # patch embedding (+ bias via the 1.0 lane): bf16 x bf16 -> f32 on the MXU
    h = jnp.dot(x, wpe_ref[...], preferred_element_type=jnp.float32)

    # per-token LayerNorm statistics only (f32, one pass: E[x^2] - E[x]^2);
    # the normalized tile is never materialized -- only the pooled sum leaves.
    mu = jnp.mean(h, axis=-1, keepdims=True)           # (tok, 1)
    msq = jnp.mean(h * h, axis=-1, keepdims=True)
    inv = lax.rsqrt(msq - mu * mu + EPS)               # (tok, 1)

    row = jnp.sum(h * inv, axis=0, keepdims=True)      # (1, Hd)   sum_r h*inv
    corr = jnp.sum(mu * inv)                           # scalar    sum_r mu*inv
    acc_ref[...] += row - corr                         # == sum_r (h-mu)*inv

    @pl.when(s == pl.num_programs(2) - 1)
    def _():
        out_ref[...] = acc_ref[...]                    # per-(core, batch) partial


# ---------------------------------------------------------------------------
# Kernel 2: combine partials + LayerNorm affine + mean scale + regressor MLP
# ---------------------------------------------------------------------------
def head_kernel(part_ref, g_ref, beta_ref, w1_ref, b1_ref, w2_ref, b2_ref,
                w3_ref, b3_ref, out_ref, *, inv_tokens):
    pooled = (part_ref[0] + part_ref[1]) * inv_tokens          # (B, Hd)
    pooled = pooled * g_ref[...] + beta_ref[...]                # LN affine
    z = jnp.dot(pooled, w1_ref[...],
                preferred_element_type=jnp.float32) + b1_ref[...]
    z = jnp.maximum(z, 0.0)
    # Dropout(0.2) is an inference-time identity; omitted.
    z = jnp.dot(z, w2_ref[...], preferred_element_type=jnp.float32) + b2_ref[...]
    z = jnp.maximum(z, 0.0)
    z = jnp.dot(z, w3_ref[...], preferred_element_type=jnp.float32) + b3_ref[...]
    out_ref[...] = z


@functools.partial(jax.jit, static_argnames=("token_tile",))
def speed_estimator(x, params, token_tile=None):
    """Pallas implementation of SpeedEstimatorSwin.forward. Returns (B, 1)."""
    wpe, g, beta, w1, b1, w2, b2, w3, b3 = params
    B, T, C, H, W = x.shape
    PDp, Hd = wpe.shape
    S = (H // P) * (W // P)
    n_tok = T * S
    assert n_tok % N_CORE_SPLIT == 0, (n_tok,)
    tokens_per_core = n_tok // N_CORE_SPLIT
    if token_tile is None:
        token_tile = _choose_token_tile(tokens_per_core)
    assert tokens_per_core % token_tile == 0, (tokens_per_core, token_tile)
    n_tiles = tokens_per_core // token_tile

    patches = extract_patches(x, PDp)                  # (B, n_tok, PDp) bf16

    cost = pl.CostEstimate(
        flops=2 * B * n_tok * PDp * Hd + 8 * B * n_tok * Hd,
        transcendentals=B * n_tok,
        bytes_accessed=(patches.size * patches.dtype.itemsize
                        + wpe.size * wpe.dtype.itemsize
                        + N_CORE_SPLIT * B * Hd * 4),
    )

    partial = pl.pallas_call(
        backbone_pool_kernel,
        out_shape=jax.ShapeDtypeStruct((N_CORE_SPLIT, B, 1, Hd), jnp.float32),
        grid_spec=pltpu.PrefetchScalarGridSpec(
            num_scalar_prefetch=0,
            grid=(N_CORE_SPLIT, B, n_tiles),
            in_specs=[
                pl.BlockSpec((pl.Squeezed(), token_tile, PDp),
                             lambda c, b, s: (b, c * n_tiles + s, 0)),
                pl.BlockSpec(wpe.shape, lambda c, b, s: (0, 0)),
            ],
            out_specs=pl.BlockSpec((pl.Squeezed(), pl.Squeezed(), 1, Hd),
                                   lambda c, b, s: (c, b, 0, 0)),
            scratch_shapes=[pltpu.VMEM((1, Hd), jnp.float32)],
        ),
        compiler_params=pltpu.CompilerParams(
            # core-split + batch are parallel (megacore), token tiles reduce.
            dimension_semantics=("parallel", "parallel", "arbitrary"),
            # 48 MiB: safe on v7x (64 MiB physical), ample for 2K-token tiles
            # at hidden=768 on v5e/v6e.
            vmem_limit_bytes=48 * 1024 * 1024,
        ),
        cost_estimate=cost,
    )(patches, wpe)

    partial = partial.reshape(N_CORE_SPLIT, B, Hd)

    speed = pl.pallas_call(
        functools.partial(head_kernel, inv_tokens=1.0 / float(n_tok)),
        out_shape=jax.ShapeDtypeStruct((B, 1), jnp.float32),
    )(partial, g, beta, w1, b1, w2, b2, w3, b3)
    return speed


def reference(x, params):
    """Plain-JAX reference of the same forward pass (sanity check)."""
    wpe, g, beta, w1, b1, w2, b2, w3, b3 = params
    with jax.default_matmul_precision("highest"):
        p = extract_patches(x, wpe.shape[0])                    # same bf16 patches
        h = jnp.einsum("bnp,ph->bnh", p, wpe,
                       preferred_element_type=jnp.float32)      # bias via 1.0 lane
        mu = jnp.mean(h, axis=-1, keepdims=True)
        var = jnp.mean(jnp.square(h - mu), axis=-1, keepdims=True)
        hn = (h - mu) * lax.rsqrt(var + EPS) * g + beta         # last_hidden_state
        pooled = jnp.mean(hn, axis=1)                           # token mean == token-mean
        z = jnp.maximum(pooled @ w1 + b1, 0.0)                  #   then frame-mean
        z = jnp.maximum(z @ w2 + b2, 0.0)
        return z @ w3 + b3                                      # (B, 1)


def init_params(key, pd, hidden):
    """Deterministic synthetic weights (shapes implied by the module)."""
    ks = jax.random.split(key, 7)
    pd_pad = _round_up(pd + 1, 64)   # bias lane + lane-friendly pad (48 -> 64)

    def lin(k, fan_in, fan_out):
        w = jax.random.normal(k, (fan_in, fan_out), jnp.float32) / np.sqrt(fan_in)
        b = jnp.zeros((1, fan_out), jnp.float32)
        return w, b

    wpe_core = jax.random.normal(ks[0], (pd, hidden), jnp.float32) / np.sqrt(pd)
    bpe = 0.1 * jax.random.normal(ks[1], (hidden,), jnp.float32)
    wpe = jnp.zeros((pd_pad, hidden), jnp.float32)
    wpe = wpe.at[:pd].set(wpe_core).at[pd].set(bpe)   # bias folded into row `pd`
    wpe = wpe.astype(jnp.bfloat16)                    # MXU-native operand dtype
    gamma = 1.0 + 0.1 * jax.random.normal(ks[2], (1, hidden), jnp.float32)
    beta = 0.1 * jax.random.normal(ks[3], (1, hidden), jnp.float32)
    w1, b1 = lin(ks[4], hidden, 512)                  # regressor[0]
    w2, b2 = lin(ks[5], 512, 128)                     # regressor[3]
    w3, b3 = lin(ks[6], 128, 1)                       # regressor[6]
    return (wpe, gamma, beta, w1, b1, w2, b2, w3, b3)


if __name__ == "__main__":
    # Small shapes: batch=2, num_frames=4, channels=3, 32x32 frames,
    # surrogate hidden_size=128 (real swinv2-tiny uses 768, also lane-aligned).
    B, T, C, H, W = 2, 4, 3, 32, 32
    HIDDEN = 128
    PD = C * P * P          # 48, padded to 64 (incl. bias lane) inside init

    key = jax.random.PRNGKey(0)
    k_x, k_p = jax.random.split(key)
    x = jax.random.normal(k_x, (B, T, C, H, W), jnp.float32)
    params = init_params(k_p, PD, HIDDEN)

    # token_tile=64 -> grid (2, B=2, 2): exercises the core split, the batch
    # axis and multi-step accumulation along the reduction axis.
    speed = jax.block_until_ready(speed_estimator(x, params, token_tile=64))
    ref = jax.block_until_ready(reference(x, params))

    assert speed.shape == (B, 1), speed.shape
    assert np.allclose(np.asarray(speed), np.asarray(ref), atol=1e-2, rtol=1e-2), (
        speed, ref)
    print("KERNEL_OK")
</pallas_src>

<mosaic_0001>
module attributes {stable_mosaic.version = 11 : i64} {
  func.func @backbone_pool_kernel(%arg0: i32, %arg1: i32, %arg2: i32, %arg3: memref<1x64x64xbf16, #tpu.memory_space<vmem>>, %arg4: memref<64x128xbf16, #tpu.memory_space<vmem>>, %arg5: memref<1x1x1x128xf32, #tpu.memory_space<vmem>>, %arg6: memref<1x128xf32, #tpu.memory_space<vmem>>) attributes {dimension_semantics = [#tpu.dimension_semantics<parallel>, #tpu.dimension_semantics<parallel>, #tpu.dimension_semantics<arbitrary>], iteration_bounds = array<i64: 2, 2, 2>, scalar_prefetch = 0 : i64, scratch_operands = 1 : i64, tpu.core_type = #tpu.core_type<tc>, window_params = [{transform_indices = @transform_0, window_bounds = array<i64: 1, 64, 64>}, {pipeline_mode = #tpu.pipeline_mode<synchronous>, transform_indices = @transform_1, window_bounds = array<i64: 64, 128>}, {transform_indices = @transform_2, window_bounds = array<i64: 1, 1, 1, 128>}]} {
    %c0_i32 = arith.constant 0 : i32
    %0 = arith.cmpi eq, %arg2, %c0_i32 : i32
    %1 = arith.extui %0 : i1 to i32
    %c0_i32_0 = arith.constant 0 : i32
    %2 = arith.cmpi ne, %1, %c0_i32_0 : i32
    scf.if %2 {
      %cst_17 = arith.constant 0.000000e+00 : f32
      %38 = vector.broadcast %cst_17 : f32 to vector<1x128xf32>
      %c0_18 = arith.constant 0 : index
      %c0_19 = arith.constant 0 : index
      %39 = vector.load %arg6[%c0_18, %c0_19] : memref<1x128xf32, #tpu.memory_space<vmem>>, vector<1x128xf32>
      tpu.vector_store %arg6[%c0_18, %c0_19], %38 {strides = array<i32>} : memref<1x128xf32, #tpu.memory_space<vmem>>, vector<1x128xf32>,
    } else {
    }
    %c0 = arith.constant 0 : index
    %c0_1 = arith.constant 0 : index
    %c0_2 = arith.constant 0 : index
    %3 = vector.load %arg3[%c0, %c0_1, %c0_2] : memref<1x64x64xbf16, #tpu.memory_space<vmem>>, vector<1x64x64xbf16>
    %4 = vector.shape_cast %3 : vector<1x64x64xbf16> to vector<64x64xbf16>
    %c0_3 = arith.constant 0 : index
    %c0_4 = arith.constant 0 : index
    %5 = vector.load %arg4[%c0_3, %c0_4] : memref<64x128xbf16, #tpu.memory_space<vmem>>, vector<64x128xbf16>
    %cst = arith.constant dense<0.000000e+00> : vector<64x128xf32>
    %6 = tpu.matmul %4, %5, %cst {dimension_numbers = #tpu.dot_dimension_numbers<[1], [0], [0], [1], [0, 0, 1, 1], [], []>} : vector<64x64xbf16>, vector<64x128xbf16>, vector<64x128xf32> -> vector<64x128xf32>
    %cst_5 = arith.constant dense<0.000000e+00> : vector<64xf32>
    %7 = vector.multi_reduction <add>, %6, %cst_5 [1] : vector<64x128xf32> to vector<64xf32>
    %8 = vector.shape_cast %7 : vector<64xf32> to vector<64x1xf32>
    %cst_6 = arith.constant 1.280000e+02 : f32
    %9 = vector.broadcast %cst_6 : f32 to vector<64x1xf32>
    %10 = arith.divf %8, %9 : vector<64x1xf32>
    %11 = arith.mulf %6, %6 : vector<64x128xf32>
    %cst_7 = arith.constant dense<0.000000e+00> : vector<64xf32>
    %12 = vector.multi_reduction <add>, %11, %cst_7 [1] : vector<64x128xf32> to vector<64xf32>
    %13 = vector.shape_cast %12 : vector<64xf32> to vector<64x1xf32>
    %cst_8 = arith.constant 1.280000e+02 : f32
    %14 = vector.broadcast %cst_8 : f32 to vector<64x1xf32>
    %15 = arith.divf %13, %14 : vector<64x1xf32>
    %16 = arith.mulf %10, %10 : vector<64x1xf32>
    %17 = arith.subf %15, %16 : vector<64x1xf32>
    %cst_9 = arith.constant 9.99999974E-6 : f32
    %18 = vector.broadcast %cst_9 : f32 to vector<64x1xf32>
    %19 = arith.addf %17, %18 : vector<64x1xf32>
    %20 = math.rsqrt %19 : vector<64x1xf32>
    %21 = vector.broadcast %20 : vector<64x1xf32> to vector<64x128xf32>
    %22 = arith.mulf %6, %21 : vector<64x128xf32>
    %cst_10 = arith.constant dense<0.000000e+00> : vector<128xf32>
    %23 = vector.multi_reduction <add>, %22, %cst_10 [0] : vector<64x128xf32> to vector<128xf32>
    %24 = vector.shape_cast %23 : vector<128xf32> to vector<1x128xf32>
    %25 = arith.mulf %10, %20 : vector<64x1xf32>
    %26 = vector.shape_cast %25 : vector<64x1xf32> to vector<1x64x1xf32>
    %cst_11 = arith.constant dense<0.000000e+00> : vector<1xf32>
    %27 = vector.multi_reduction <add>, %26, %cst_11 [1, 2] : vector<1x64x1xf32> to vector<1xf32>
    %28 = vector.shape_cast %27 : vector<1xf32> to vector<1x1x1xf32>
    %29 = vector.extract %28[0, 0, 0] : f32 from vector<1x1x1xf32>
    %c0_12 = arith.constant 0 : index
    %c0_13 = arith.constant 0 : index
    %30 = vector.load %arg6[%c0_12, %c0_13] : memref<1x128xf32, #tpu.memory_space<vmem>>, vector<1x128xf32>
    %31 = vector.broadcast %29 : f32 to vector<1x128xf32>
    %32 = arith.subf %24, %31 : vector<1x128xf32>
    %33 = arith.addf %30, %32 : vector<1x128xf32>
    %c0_14 = arith.constant 0 : index
    %c0_15 = arith.constant 0 : index
    %34 = vector.load %arg6[%c0_14, %c0_15] : memref<1x128xf32, #tpu.memory_space<vmem>>, vector<1x128xf32>
    tpu.vector_store %arg6[%c0_14, %c0_15], %33 {strides = array<i32>} : memref<1x128xf32, #tpu.memory_space<vmem>>, vector<1x128xf32>,
    %c1_i32 = arith.constant 1 : i32
    %35 = arith.cmpi eq, %arg2, %c1_i32 : i32
    %36 = arith.extui %35 : i1 to i32
    %c0_i32_16 = arith.constant 0 : i32
    %37 = arith.cmpi ne, %36, %c0_i32_16 : i32
    scf.if %37 {
      %c0_17 = arith.constant 0 : index
      %c0_18 = arith.constant 0 : index
      %38 = vector.load %arg6[%c0_17, %c0_18] : memref<1x128xf32, #tpu.memory_space<vmem>>, vector<1x128xf32>
      %c0_19 = arith.constant 0 : index
      %c0_20 = arith.constant 0 : index
      %c0_21 = arith.constant 0 : index
      %c0_22 = arith.constant 0 : index
      %39 = vector.load %arg5[%c0_19, %c0_20, %c0_21, %c0_22] : memref<1x1x1x128xf32, #tpu.memory_space<vmem>>, vector<1x1x1x128xf32>
      %40 = vector.shape_cast %39 : vector<1x1x1x128xf32> to vector<1x128xf32>
      %41 = vector.shape_cast %38 : vector<1x128xf32> to vector<1x1x1x128xf32>
      tpu.vector_store %arg5[%c0_19, %c0_20, %c0_21, %c0_22], %41 {strides = array<i32>} : memref<1x1x1x128xf32, #tpu.memory_space<vmem>>, vector<1x1x1x128xf32>,
    } else {
    }
    return
  }
  func.func @transform_0(%arg0: i32, %arg1: i32, %arg2: i32) -> (i32, i32, i32) {
    %c2_i32 = arith.constant 2 : i32
    %0 = arith.muli %arg0, %c2_i32 : i32
    %1 = arith.addi %0, %arg2 : i32
    %c0_i32 = arith.constant 0 : i32
    %c0_i32_0 = arith.constant 0 : i32
    return %arg1, %1, %c0_i32 : i32, i32, i32
  }
  func.func @transform_1(%arg0: i32, %arg1: i32, %arg2: i32) -> (i32, i32) {
    %c0_i32 = arith.constant 0 : i32
    %c0_i32_0 = arith.constant 0 : i32
    %c0_i32_1 = arith.constant 0 : i32
    return %c0_i32, %c0_i32_0 : i32, i32
  }
  func.func @transform_2(%arg0: i32, %arg1: i32, %arg2: i32) -> (i32, i32, i32, i32) {
    %c0_i32 = arith.constant 0 : i32
    %c0_i32_0 = arith.constant 0 : i32
    %c0_i32_1 = arith.constant 0 : i32
    return %arg0, %arg1, %c0_i32, %c0_i32_0 : i32, i32, i32, i32
  }
}

module attributes {stable_mosaic.version = 11 : i64} {
  func.func @head_kernel(%arg0: memref<2x2x128xf32, #tpu.memory_space<vmem>>, %arg1: memref<1x128xf32, #tpu.memory_space<vmem>>, %arg2: memref<1x128xf32, #tpu.memory_space<vmem>>, %arg3: memref<128x512xf32, #tpu.memory_space<vmem>>, %arg4: memref<1x512xf32, #tpu.memory_space<vmem>>, %arg5: memref<512x128xf32, #tpu.memory_space<vmem>>, %arg6: memref<1x128xf32, #tpu.memory_space<vmem>>, %arg7: memref<128x1xf32, #tpu.memory_space<vmem>>, %arg8: memref<1x1xf32, #tpu.memory_space<vmem>>, %arg9: memref<2x1xf32, #tpu.memory_space<vmem>>) attributes {dimension_semantics = [], scalar_prefetch = 0 : i64, scratch_operands = 0 : i64, tpu.core_type = #tpu.core_type<tc>} {
    %c0 = arith.constant 0 : index
    %c0_0 = arith.constant 0 : index
    %c0_1 = arith.constant 0 : index
    %0 = vector.load %arg0[%c0, %c0_0, %c0_1] : memref<2x2x128xf32, #tpu.memory_space<vmem>>, vector<1x2x128xf32>
    %1 = vector.shape_cast %0 : vector<1x2x128xf32> to vector<2x128xf32>
    %c1 = arith.constant 1 : index
    %c0_2 = arith.constant 0 : index
    %c0_3 = arith.constant 0 : index
    %2 = vector.load %arg0[%c1, %c0_2, %c0_3] : memref<2x2x128xf32, #tpu.memory_space<vmem>>, vector<1x2x128xf32>
    %3 = vector.shape_cast %2 : vector<1x2x128xf32> to vector<2x128xf32>
    %4 = arith.addf %1, %3 : vector<2x128xf32>
    %cst = arith.constant 3.906250e-03 : f32
    %5 = vector.broadcast %cst : f32 to vector<2x128xf32>
    %6 = arith.mulf %4, %5 : vector<2x128xf32>
    %c0_4 = arith.constant 0 : index
    %c0_5 = arith.constant 0 : index
    %7 = vector.load %arg1[%c0_4, %c0_5] : memref<1x128xf32, #tpu.memory_space<vmem>>, vector<1x128xf32>
    %8 = vector.broadcast %7 : vector<1x128xf32> to vector<2x128xf32>
    %9 = arith.mulf %6, %8 : vector<2x128xf32>
    %c0_6 = arith.constant 0 : index
    %c0_7 = arith.constant 0 : index
    %10 = vector.load %arg2[%c0_6, %c0_7] : memref<1x128xf32, #tpu.memory_space<vmem>>, vector<1x128xf32>
    %11 = vector.broadcast %10 : vector<1x128xf32> to vector<2x128xf32>
    %12 = arith.addf %9, %11 : vector<2x128xf32>
    %c0_8 = arith.constant 0 : index
    %c0_9 = arith.constant 0 : index
    %13 = vector.load %arg3[%c0_8, %c0_9] : memref<128x512xf32, #tpu.memory_space<vmem>>, vector<128x512xf32>
    %cst_10 = arith.constant dense<0.000000e+00> : vector<2x512xf32>
    %14 = tpu.matmul %12, %13, %cst_10 {dimension_numbers = #tpu.dot_dimension_numbers<[1], [0], [0], [1], [0, 0, 1, 1], [], []>} : vector<2x128xf32>, vector<128x512xf32>, vector<2x512xf32> -> vector<2x512xf32>
    %c0_11 = arith.constant 0 : index
    %c0_12 = arith.constant 0 : index
    %15 = vector.load %arg4[%c0_11, %c0_12] : memref<1x512xf32, #tpu.memory_space<vmem>>, vector<1x512xf32>
    %16 = vector.broadcast %15 : vector<1x512xf32> to vector<2x512xf32>
    %17 = arith.addf %14, %16 : vector<2x512xf32>
    %cst_13 = arith.constant 0.000000e+00 : f32
    %18 = vector.broadcast %cst_13 : f32 to vector<2x512xf32>
    %19 = arith.maximumf %17, %18 : vector<2x512xf32>
    %c0_14 = arith.constant 0 : index
    %c0_15 = arith.constant 0 : index
    %20 = vector.load %arg5[%c0_14, %c0_15] : memref<512x128xf32, #tpu.memory_space<vmem>>, vector<512x128xf32>
    %cst_16 = arith.constant dense<0.000000e+00> : vector<2x128xf32>
    %21 = tpu.matmul %19, %20, %cst_16 {dimension_numbers = #tpu.dot_dimension_numbers<[1], [0], [0], [1], [0, 0, 1, 1], [], []>} : vector<2x512xf32>, vector<512x128xf32>, vector<2x128xf32> -> vector<2x128xf32>
    %c0_17 = arith.constant 0 : index
    %c0_18 = arith.constant 0 : index
    %22 = vector.load %arg6[%c0_17, %c0_18] : memref<1x128xf32, #tpu.memory_space<vmem>>, vector<1x128xf32>
    %23 = vector.broadcast %22 : vector<1x128xf32> to vector<2x128xf32>
    %24 = arith.addf %21, %23 : vector<2x128xf32>
    %cst_19 = arith.constant 0.000000e+00 : f32
    %25 = vector.broadcast %cst_19 : f32 to vector<2x128xf32>
    %26 = arith.maximumf %24, %25 : vector<2x128xf32>
    %c0_20 = arith.constant 0 : index
    %c0_21 = arith.constant 0 : index
    %27 = vector.load %arg7[%c0_20, %c0_21] : memref<128x1xf32, #tpu.memory_space<vmem>>, vector<128x1xf32>
    %cst_22 = arith.constant dense<0.000000e+00> : vector<2x1xf32>
    %28 = tpu.matmul %26, %27, %cst_22 {dimension_numbers = #tpu.dot_dimension_numbers<[1], [0], [0], [1], [0, 0, 1, 1], [], []>} : vector<2x128xf32>, vector<128x1xf32>, vector<2x1xf32> -> vector<2x1xf32>
    %c0_23 = arith.constant 0 : index
    %c0_24 = arith.constant 0 : index
    %29 = vector.load %arg8[%c0_23, %c0_24] : memref<1x1xf32, #tpu.memory_space<vmem>>, vector<1x1xf32>
    %30 = vector.broadcast %29 : vector<1x1xf32> to vector<2x1xf32>
    %31 = arith.addf %28, %30 : vector<2x1xf32>
    %c0_25 = arith.constant 0 : index
    %c0_26 = arith.constant 0 : index
    %32 = vector.load %arg9[%c0_25, %c0_26] : memref<2x1xf32, #tpu.memory_space<vmem>>, vector<2x1xf32>
    tpu.vector_store %arg9[%c0_25, %c0_26], %31 {strides = array<i32>} : memref<2x1xf32, #tpu.memory_space<vmem>>, vector<2x1xf32>,
    return
  }
}

</mosaic_0001>

<bundles_post_ra>
// kernel: speed_estimator.2
= control target key start
LH: loop header
LB: loop body
LE: loop exit
PB: predicated region body
PF: predicated region fallthrough
CT: control target
= control target key end

     0   :  { %s848_s9 = smov 0   ;;  %s850_s10 = smov 0   ;;  %s1109_s0 = inlined_call_operand.vmem [shape: bf16[2,256,64], index: 0, kind: input, shape index: {}]   ;;  %s1110_s1 = inlined_call_operand.vmem [shape: bf16[64,128], index: 1, kind: input, shape index: {}]   ;;  %s1111_s2 = inlined_call_operand.vmem [shape: f32[2,2,1,128], index: 2, kind: output, shape index: {}]  }
   0x1   :  { %s852_s11 = smov 0   ;;  %s854_s12 = smov 0  }
   0x2   :  { %s856_s13 = smov 0   ;;  %s858_s14 = smov 0  }
   0x3   :  { %s860_s15 = smov 0  }
   0x4 LB: > { %s24_s16 = sadd.s32 1, %s817_s12  ;;  %s27_s17 = sadd.s32 1, %s821_s13  ;;  %s829_s15 = sphi %s860_s15, %s12_s15   ;;  %s825_s14 = sphi %s858_s14, %s1117_s14   ;;  %s821_s13 = sphi %s856_s13, %s1116_s13   ;;  %s817_s12 = sphi %s854_s12, %s1115_s12   ;;  %s813_s11 = sphi %s852_s11, %s1114_s11   ;;  %s809_s10 = sphi %s850_s10, %s1113_s10   ;;  %s805_s9 = sphi %s848_s9, %s1112_s9  }
   0x5   : > { %p25_p0 = scmp.ge.s32.totalorder %s24_s16, 2  ;;  %p631_p1 = scmp.ge.s32.totalorder %s829_s15, 1 }
   0x6   : > { %p148_p2 = scmp.lt.s32.totalorder %s829_s15, 9  ;;  %s31_s18 = sadd.s32 1, %s825_s14 }
   0x7   : > { %s1119_s16 = smov (%p25_p0, %s24_s16), 0  ;;  %s1121_s17 = smov (!%p25_p0, %s27_s17), %s821_s13 }
   0x8   : > { %p149_p3 = pnand %p631_p1, %p148_p2  ;;  %p29_p4 = scmp.ge.s32.totalorder %s1121_s17, 2 }
   0x9   : > { %s632_s19 = sshll.u32 (!%p149_p3), %s813_s11, 1  ;;  %p181_p6 = scmp.lt.s32.totalorder (!%p149_p3), %s809_s10, 1 }
   0xa   : > { %s1123_s17 = smov (%p29_p4, %s1121_s17), 0  ;;  %s1125_s18 = smov (!%p29_p4, %s31_s18), %s825_s14 }
   0xb   : > { %p33_p5 = scmp.ge.s32.totalorder %s1125_s18, 2  ;;  %152 = sbr.rel (%p149_p3) target bundleno = 548 (0x224), region = 28 }
   0xc   : > { %s179_s20 = sadd.s32 (!%p149_p3), %s805_s9, %s632_s19  ;;  %p192_p7 = scmp.lt.s32.totalorder (!%p149_p3), %s813_s11, 1 }
   0xd   : > { %s1127_s18 = smov (%p33_p5, %s1125_s18), 0  ;;  %s633_s21 = sshll.u32 (!%p149_p3), %s179_s20, 3 }
   0xe   : > { %p183_p8 = scmp.lt.s32.totalorder (!%p149_p3), %s633_s21, 31  ;;  %p637_p9 = scmp.ne.s32.totalorder (!%p149_p3), %s805_s9, 0 }
  0x10   : > { %s1129_s10 = smov (!%p181_p6, %s809_s10), 1  ;;  %s1131_s21 = smov (!%p183_p8, %s633_s21), 31 }
  0x11   : > { %s634_s22 = sshll.u32 %s1129_s10, 5  ;;  %s1133_s11 = smov (!%p192_p7, %s813_s11), 1 }
  0x12   : > { %s186_s23 = sadd.s32 %s634_s22, %s1131_s21  ;;  %s636_s25 = sshll.u32 %s1133_s11, 1 }
  0x13   : > { %s635_s24 = sshll.u32 %s186_s23, 2  ;;  %s896_s29 = sadd.s32 %s636_s25, %s1129_s10 }
  0x14   : > { %s188_s28 = scalar_lea.vmem %s1109_s0, %s635_s24  ;;  %s198_s4 = scalar_lea.vmem %s1111_s2, %s896_s29 }
  0x15   : > { %203 = sbr.rel (%p637_p9) target bundleno = 28 (0x1c), region = 32 }
  0x1a   : > { %v831_v0 = vmov 0.0  }
  0x1b   : > { %204 = vst [vmem:[#allocation2] sm:$0x1] %v831_v0 }
  0x1c PF: > { %v684_v1 = vld [vmem:[%s1110_s1 + $0x18] sm:$0xff]  ;;  %v683_v2 = vld [vmem:[%s1110_s1 + $0x10] sm:$0xff]  ;;  %v682_v3 = vld [vmem:[%s1110_s1 + $0x8] sm:$0xff]  ;;  %vm265_vm0 = vcmask 523264   ;;  %v832_v25 = vmov 128.0   ;;  %vm503_vm13 = vcmask 7168  }
  0x1d   : > { %282 = vmatpush.bf16.msra.mxu0 %v684_v1  ;;  %685 = vmatpush.bf16.msra.mxu1 %v684_v1  ;;  %v681_v4 = vld [vmem:[%s1110_s1] sm:$0xff]  ;;  %v678_v6 = vld [vmem:[%s188_s28 + $0x8] sm:$0xff]  ;;  %v680_v7 = vld [vmem:[%s188_s28 + $0x18] sm:$0xff]  ;;  %757 = vrcp.f32 %v832_v25  ;;  %p674_p10 = scmp.ne.s32.totalorder %s805_s9, 1 }
  0x1e   : > { %687 = vmatpush.bf16.msra.mxu3 %v684_v1  ;;  %686 = vmatpush.bf16.msra.mxu2 %v684_v1  ;;  %v677_v5 = vld [vmem:[%s188_s28] sm:$0xff]  ;;  %v679_v8 = vld [vmem:[%s188_s28 + $0x10] sm:$0xff] }
  0x21   : > { %283 = vmatpush.bf16.msra.mxu0 %v683_v2  ;;  %688 = vmatpush.bf16.msra.mxu1 %v683_v2 }
  0x22   : > { %690 = vmatpush.bf16.msra.mxu3 %v683_v2  ;;  %689 = vmatpush.bf16.msra.mxu2 %v683_v2 }
  0x23   : > { %v758_v26 = vpop.eup %757 }
  0x24   : > { %v324_v27 = vmul.f32 128.0, %v758_v26  ;;  %vm328_vm1 = vweird.f32 %v758_v26 }
  0x25   : > { %284 = vmatpush.bf16.msra.mxu0 %v682_v3  ;;  %691 = vmatpush.bf16.msra.mxu1 %v682_v3 }
  0x26   : > { %693 = vmatpush.bf16.msra.mxu3 %v682_v3  ;;  %692 = vmatpush.bf16.msra.mxu2 %v682_v3  ;;  %v325_v28 = vsub.f32 1.0, %v324_v27 }
  0x28   : > { %v326_v29 = vmul.f32 %v758_v26, %v325_v28 }
  0x29   : > { %285 = vmatpush.bf16.msra.mxu0 %v681_v4  ;;  %694 = vmatpush.bf16.msra.mxu1 %v681_v4 }
  0x2a   : > { %696 = vmatpush.bf16.msra.mxu3 %v681_v4  ;;  %695 = vmatpush.bf16.msra.mxu2 %v681_v4  ;;  %v327_v30 = vadd.f32 %v758_v26, %v326_v29 }
  0x2c   : > { %670 = vmatmul.msk.bf16.vlgmr.msra.gmra.mxu0 %vm265_vm0, %v677_v5  ;;  %671 = vmatmul.msk.bf16.vlgmr.msra.gmra.mxu1 %vm265_vm0, %v678_v6  ;;  %v955_v33 = vsel %vm328_vm1, %v758_v26, %v327_v30 }
  0x2d   : > { %673 = vmatmul.msk.bf16.vlgmr.msra.gmra.mxu3 %vm265_vm0, %v680_v7  ;;  %672 = vmatmul.msk.bf16.vlgmr.msra.gmra.mxu2 %vm265_vm0, %v679_v8 }
  0xa9   : > { %v915_v9 = vpop.f32.mrf.mxu0  ;;  %v917_v10 = vpop.f32.mrf.mxu1 }
  0xaa   : > { %311 = vadd.xlane.f32.xlu1 %v917_v10  ;;  %307 = vadd.xlane.f32.xlu0 %v915_v9  ;;  %v340_v11 = vmul.f32 %v917_v10, %v917_v10  ;;  %v338_v13 = vmul.f32 %v915_v9, %v915_v9 }
  0xb0   : > { %v923_v12 = vpop.f32.mrf.mxu3  ;;  %v928_v14 = vpop.f32.mrf.mxu2 }
  0xb1   : > { %319 = vadd.xlane.f32.xlu2 %v923_v12  ;;  %v930_v15 = vpop.f32.mrf.mxu1  ;;  %v932_v16 = vpop.f32.mrf.mxu0  ;;  %v342_v18 = vmul.f32 %v928_v14, %v928_v14  ;;  %v344_v23 = vmul.f32 %v923_v12, %v923_v12 }
  0xb2   : > { %350 = vadd.xlane.f32.xlu0 %v340_v11  ;;  %346 = vadd.xlane.f32.xlu1 %v338_v13  ;;  %v339_v17 = vmul.f32 %v932_v16, %v932_v16  ;;  %v341_v20 = vmul.f32 %v930_v15, %v930_v15 }
  0xb8   : > { %v941_v19 = vpop.f32.mrf.mxu2  ;;  %v948_v22 = vpop.f32.mrf.mxu3 }
  0xb9   : > { %313 = vadd.xlane.f32.xlu2 %v930_v15  ;;  %v343_v21 = vmul.f32 %v941_v19, %v941_v19  ;;  %v345_v24 = vmul.f32 %v948_v22, %v948_v22 }
  0xba   : > { %315 = vadd.xlane.f32.xlu1 %v928_v14  ;;  %309 = vadd.xlane.f32.xlu0 %v932_v16 }
  0xc1   : > { %348 = vadd.xlane.f32.xlu2 %v339_v17 }
  0xc2   : > { %354 = vadd.xlane.f32.xlu1 %v342_v18  ;;  %317 = vadd.xlane.f32.xlu0 %v941_v19 }
  0xc9   : > { %352 = vadd.xlane.f32.xlu2 %v341_v20 }
  0xca   : > { %321 = vadd.xlane.f32.xlu1 %v948_v22  ;;  %356 = vadd.xlane.f32.xlu0 %v343_v21 }
  0xd1   : > { %358 = vadd.xlane.f32.xlu2 %v344_v23 }
  0xd2   : > { %360 = vadd.xlane.f32.xlu0 %v345_v24 }
 0x11d   : > { %v312_v31 = vpop.xlane.xlu1 %311  ;;  %v308_v32 = vpop.xlane.xlu0 %307 }
 0x11e   : > { %v958_v34 = vmul.f32 %v955_v33, %v312_v31  ;;  %v961_v35 = vmul.f32 %v955_v33, %v308_v32 }
 0x120   : > { %v372_v36 = vmul.f32 %v958_v34, %v958_v34  ;;  %v370_v40 = vmul.f32 %v961_v35, %v961_v35 }
 0x124   : > { %v320_v37 = vpop.xlane.xlu2 %319 }
 0x125   : > { %v351_v38 = vpop.xlane.xlu0 %350  ;;  %v347_v39 = vpop.xlane.xlu1 %346  ;;  %v1013_v25 = vmul.f32 %v955_v33, %v320_v37 }
 0x126   : > { %v364_v41 = vmul.f32 %v351_v38, %v955_v33  ;;  %v362_v42 = vmul.f32 %v347_v39, %v955_v33 }
 0x127   : > { %v376_v39 = vmul.f32 %v1013_v25, %v1013_v25 }
 0x128   : > { %v380_v43 = vsub.f32 %v364_v41, %v372_v36  ;;  %v378_v44 = vsub.f32 %v362_v42, %v370_v40 }
 0x12a   : > { %v969_v45 = vadd.f32 1e-05, %v380_v43  ;;  %v971_v46 = vadd.f32 1e-05, %v378_v44 }
 0x12c   : > { %v314_v47 = vpop.xlane.xlu2 %313  ;;  %759 = vrsqrt.f32 %v971_v46  ;;  %vm400_vm2 = vweird.f32 %v971_v46  ;;  %vm420_vm5 = vweird.f32 %v969_v45 }
 0x12d   : > { %v316_v48 = vpop.xlane.xlu1 %315  ;;  %v310_v49 = vpop.xlane.xlu0 %309  ;;  %761 = vrsqrt.f32 %v969_v45  ;;  %v997_v2 = vmul.f32 %v955_v33, %v314_v47 }
 0x12e   : > { %v976_v50 = vmul.f32 %v955_v33, %v310_v49  ;;  %v979_v51 = vmul.f32 %v955_v33, %v316_v48 }
 0x12f   : > { %v373_v11 = vmul.f32 %v997_v2, %v997_v2 }
 0x130   : > { %v371_v56 = vmul.f32 %v976_v50, %v976_v50  ;;  %v374_v60 = vmul.f32 %v979_v51, %v979_v51 }
 0x132   : > { %v981_v52 = vpop.eup %759 }
 0x133   : > { %v983_v53 = vpop.eup %761  ;;  %v395_v55 = vmul.f32 %v981_v52, %v971_v46  ;;  %vm401_vm3 = vweird.f32 %v981_v52 }
 0x134   : > { %v349_v54 = vpop.xlane.xlu2 %348  ;;  %v415_v62 = vmul.f32 %v983_v53, %v969_v45  ;;  %vm421_vm4 = vweird.f32 %v983_v53  ;;  %vm402_vm6 = vmor %vm400_vm2, %vm401_vm3 }
 0x135   : > { %v363_v57 = vmul.f32 %v349_v54, %v955_v33  ;;  %v355_v58 = vpop.xlane.xlu1 %354  ;;  %v318_v59 = vpop.xlane.xlu0 %317  ;;  %v396_v1 = vmul.f32 %v981_v52, %v395_v55  ;;  %vm422_vm9 = vmor %vm420_vm5, %vm421_vm4 }
 0x136   : > { %v366_v61 = vmul.f32 %v355_v58, %v955_v33  ;;  %v416_v5 = vmul.f32 %v983_v53, %v415_v62  ;;  %v1003_v6 = vmul.f32 %v955_v33, %v318_v59 }
 0x137   : > { %v379_v63 = vsub.f32 %v363_v57, %v371_v56  ;;  %v397_v8 = vmul.f32 0.5, %v396_v1 }
 0x138   : > { %v382_v0 = vsub.f32 %v366_v61, %v374_v60  ;;  %v417_v18 = vmul.f32 0.5, %v416_v5  ;;  %v375_v20 = vmul.f32 %v1003_v6, %v1003_v6 }
 0x139   : > { %v387_v3 = vadd.f32 1e-05, %v379_v63  ;;  %v398_v27 = vsub.f32 1.5, %v397_v8 }
 0x13a   : > { %v999_v4 = vadd.f32 1e-05, %v382_v0  ;;  %v418_v36 = vsub.f32 1.5, %v417_v18 }
 0x13b   : > { %763 = vrsqrt.f32 %v387_v3  ;;  %v399_v42 = vmul.f32 %v981_v52, %v398_v27  ;;  %vm410_vm8 = vweird.f32 %v387_v3 }
 0x13c   : > { %765 = vrsqrt.f32 %v999_v4  ;;  %v353_v7 = vpop.xlane.xlu2 %352  ;;  %v419_v55 = vmul.f32 %v983_v53, %v418_v36  ;;  %vm440_vm10 = vweird.f32 %v999_v4 }
 0x13d   : > { %v365_v13 = vmul.f32 %v353_v7, %v955_v33  ;;  %v357_v17 = vpop.xlane.xlu0 %356  ;;  %v322_v23 = vpop.xlane.xlu1 %321  ;;  %v403_v61 = vsel %vm402_vm6, %v981_v52, %v399_v42 }
 0x13e   : > { %v367_v24 = vmul.f32 %v357_v17, %v955_v33  ;;  %v1018_v32 = vmul.f32 %v955_v33, %v322_v23  ;;  %v423_v46 = vsel %vm422_vm9, %v983_v53, %v419_v55  ;;  %v495_v8 = vmul.f32 %v403_v61, %v961_v35 }
 0x13f   : > { %v381_v21 = vsub.f32 %v365_v13, %v373_v11  ;;  %v476_v17 = vmul.f32 %v423_v46, %v917_v10  ;;  %v497_v35 = vmul.f32 %v423_v46, %v958_v34 }
 0x140   : > { %v383_v29 = vsub.f32 %v367_v24, %v375_v20  ;;  %v377_v49 = vmul.f32 %v1018_v32, %v1018_v32 }
 0x141   : > { %v764_v26 = vpop.eup %763  ;;  %v1015_v28 = vadd.f32 1e-05, %v381_v21 }
 0x142   : > { %v766_v30 = vpop.eup %765  ;;  %v405_v31 = vmul.f32 %v764_v26, %v387_v3  ;;  %v1025_v40 = vadd.f32 1e-05, %v383_v29  ;;  %vm411_vm7 = vweird.f32 %v764_v26  ;;  %v474_v3 = vmul.f32 %v403_v61, %v915_v9 }
 0x143   : > { %v435_v38 = vmul.f32 %v766_v30, %v999_v4  ;;  %767 = vrsqrt.f32 %v1015_v28  ;;  %vm412_vm11 = vmor %vm410_vm8, %vm411_vm7  ;;  %vm441_vm12 = vweird.f32 %v766_v30  ;;  %vm430_vm0 = vweird.f32 %v1015_v28 }
 0x144   : > { %v406_v37 = vmul.f32 %v764_v26, %v405_v31  ;;  %v359_v41 = vpop.xlane.xlu2 %358  ;;  %769 = vrsqrt.f32 %v1025_v40  ;;  %vm442_vm14 = vmor %vm440_vm10, %vm441_vm12  ;;  %vm450_vm3 = vweird.f32 %v1025_v40 }
 0x145   : > { %v436_v43 = vmul.f32 %v766_v30, %v435_v38  ;;  %v368_v44 = vmul.f32 %v359_v41, %v955_v33  ;;  %v361_v47 = vpop.xlane.xlu0 %360 }
 0x146   : > { %v407_v48 = vmul.f32 0.5, %v406_v37  ;;  %v369_v54 = vmul.f32 %v361_v47, %v955_v33  ;;  %v507_v37 = vsel %vm503_vm13, %v497_v35, 0.0 }
 0x147   : > { %v437_v56 = vmul.f32 0.5, %v436_v43  ;;  %v384_v57 = vsub.f32 %v368_v44, %v376_v39 }
 0x148   : > { %v408_v58 = vsub.f32 1.5, %v407_v48  ;;  %v385_v59 = vsub.f32 %v369_v54, %v377_v49 }
 0x149   : > { %v768_v60 = vpop.eup %767  ;;  %v438_v62 = vsub.f32 1.5, %v437_v56  ;;  %v1040_v33 = vadd.f32 1e-05, %v384_v57 }
 0x14a   : > { %v409_v63 = vmul.f32 %v764_v26, %v408_v58  ;;  %v425_v0 = vmul.f32 %v768_v60, %v1015_v28  ;;  %v1044_v45 = vadd.f32 1e-05, %v385_v59  ;;  %v770_v52 = vpop.eup %769  ;;  %vm431_vm15 = vweird.f32 %v768_v60 }
 0x14b   : > { %v439_v1 = vmul.f32 %v766_v30, %v438_v62  ;;  %771 = vrsqrt.f32 %v1040_v33  ;;  %v445_v53 = vmul.f32 %v770_v52, %v1025_v40  ;;  %vm432_vm1 = vmor %vm430_vm0, %vm431_vm15  ;;  %vm451_vm2 = vweird.f32 %v770_v52 }
 0x14c   : > { %v413_v5 = vsel %vm412_vm11, %v764_v26, %v409_v63  ;;  %v426_v7 = vmul.f32 %v768_v60, %v425_v0  ;;  %773 = vrsqrt.f32 %v1044_v45  ;;  %vm452_vm4 = vmor %vm450_vm3, %vm451_vm2  ;;  %vm460_vm7 = vweird.f32 %v1040_v33 }
 0x14d   : > { %v475_v11 = vmul.f32 %v413_v5, %v932_v16  ;;  %v496_v13 = vmul.f32 %v413_v5, %v976_v50  ;;  %v443_v21 = vsel %vm442_vm14, %v766_v30, %v439_v1  ;;  %v446_v23 = vmul.f32 %v770_v52, %v445_v53 }
 0x14e   : > { %v427_v18 = vmul.f32 0.5, %v426_v7  ;;  %v504_v50 = vsel %vm503_vm13, %v495_v8, 0.0  ;;  %v499_v31 = vmul.f32 %v443_v21, %v979_v51  ;;  %v478_v51 = vmul.f32 %v443_v21, %v928_v14 }
 0x14f   : > { %v482_v9 = vadd.f32 %v475_v11, %v474_v3  ;;  %v505_v20 = vsel %vm503_vm13, %v496_v13, 0.0  ;;  %v447_v10 = vmul.f32 0.5, %v446_v23  ;;  %vm470_vm9 = vweird.f32 %v1044_v45 }
 0x150   : > { %v428_v24 = vsub.f32 1.5, %v427_v18  ;;  %v506_v36 = vadd.f32 %v505_v20, %v504_v50  ;;  %v511_v48 = vsel %vm503_vm13, %v499_v31, 0.0 }
 0x151   : > { %v772_v16 = vpop.eup %771  ;;  %v483_v26 = vadd.f32 %v482_v9, %v476_v17  ;;  %v448_v30 = vsub.f32 1.5, %v447_v10 }
 0x152   : > { %v774_v27 = vpop.eup %773  ;;  %v429_v4 = vmul.f32 %v768_v60, %v428_v24  ;;  %v455_v29 = vmul.f32 %v772_v16, %v1040_v33  ;;  %v508_v47 = vadd.f32 %v507_v37, %v506_v36  ;;  %vm461_vm5 = vweird.f32 %v772_v16  ;;  %v528_v24 = vld [vmem:[#allocation2] sm:$0x1] }
 0x153   : > { %v465_v34 = vmul.f32 %v774_v27, %v1044_v45  ;;  %v449_v42 = vmul.f32 %v770_v52, %v448_v30  ;;  %vm471_vm6 = vweird.f32 %v774_v27  ;;  %vm462_vm8 = vmor %vm460_vm7, %vm461_vm5 }
 0x154   : > { %v433_v38 = vsel %vm432_vm1, %v768_v60, %v429_v4  ;;  %v456_v39 = vmul.f32 %v772_v16, %v455_v29  ;;  %vm472_vm10 = vmor %vm470_vm9, %vm471_vm6 }
 0x155   : > { %v477_v28 = vmul.f32 %v433_v38, %v930_v15  ;;  %v498_v41 = vmul.f32 %v433_v38, %v997_v2  ;;  %v466_v43 = vmul.f32 %v774_v27, %v465_v34  ;;  %v453_v55 = vsel %vm452_vm4, %v770_v52, %v449_v42 }
 0x156   : > { %v457_v44 = vmul.f32 0.5, %v456_v39  ;;  %v479_v2 = vmul.f32 %v453_v55, %v941_v19  ;;  %v500_v14 = vmul.f32 %v453_v55, %v1003_v6 }
 0x157   : > { %v484_v49 = vadd.f32 %v483_v26, %v477_v28  ;;  %v467_v54 = vmul.f32 0.5, %v466_v43  ;;  %v509_v40 = vsel %vm503_vm13, %v498_v41, 0.0 }
 0x158   : > { %v458_v56 = vsub.f32 1.5, %v457_v44  ;;  %v510_v15 = vadd.f32 %v509_v40, %v508_v47  ;;  %v513_v1 = vsel %vm503_vm13, %v500_v14, 0.0 }
 0x159   : > { %v468_v57 = vsub.f32 1.5, %v467_v54  ;;  %v485_v58 = vadd.f32 %v484_v49, %v478_v51 }
 0x15a   : > { %v459_v59 = vmul.f32 %v772_v16, %v458_v56  ;;  %v512_v60 = vadd.f32 %v511_v48, %v510_v15 }
 0x15b   : > { %v469_v61 = vmul.f32 %v774_v27, %v468_v57  ;;  %v486_v62 = vadd.f32 %v485_v58, %v479_v2 }
 0x15c   : > { %v463_v63 = vsel %vm462_vm8, %v772_v16, %v459_v59  ;;  %v514_v52 = vadd.f32 %v513_v1, %v512_v60 }
 0x15d   : > { %v473_v0 = vsel %vm472_vm10, %v774_v27, %v469_v61  ;;  %v501_v46 = vmul.f32 %v463_v63, %v1013_v25  ;;  %v480_v19 = vmul.f32 %v463_v63, %v923_v12 }
 0x15e   : > { %v481_v6 = vmul.f32 %v473_v0, %v948_v22  ;;  %v502_v33 = vmul.f32 %v473_v0, %v1018_v32 }
 0x15f   : > { %v515_v3 = vsel %vm503_vm13, %v501_v46, 0.0  ;;  %v487_v5 = vadd.f32 %v486_v62, %v480_v19 }
 0x160   : > { %v516_v45 = vadd.f32 %v515_v3, %v514_v52  ;;  %v517_v7 = vsel %vm503_vm13, %v502_v33, 0.0 }
 0x161   : > { %v488_v8 = vadd.f32 %v487_v5, %v481_v6 }
 0x162   : > { %v518_v11 = vadd.f32 %v517_v7, %v516_v45 }
 0x163   : > { %v489_v22 = vrot.slane %v488_v8, 4 }
 0x164   : > { %519 = vadd.xlane.f32.xlu1 %v518_v11 }
 0x165   : > { %v490_v32 = vadd.f32 %v489_v22, %v488_v8 }
 0x167   : > { %v491_v20 = vrot.slane %v490_v32, 2 }
 0x169   : > { %v492_v21 = vadd.f32 %v491_v20, %v490_v32 }
 0x16b   : > { %v493_v23 = vrot.slane %v492_v21, 1 }
 0x16d   : > { %v494_v35 = vadd.f32 %v493_v23, %v492_v21 }
 0x1d7   : > { %v520_v13 = vpop.xlane.xlu1 %519 }
 0x1d8   : > { %v521_v25 = vrot.slane %v520_v13, 4 }
 0x1da   : > { %v522_v53 = vadd.f32 %v521_v25, %v520_v13 }
 0x1dc   : > { %v523_v17 = vrot.slane %v522_v53, 2 }
 0x1de   : > { %v524_v18 = vadd.f32 %v523_v17, %v522_v53 }
 0x1e0   : > { %v525_v12 = vrot.slane %v524_v18, 1 }
 0x1e2   : > { %v526_v9 = vadd.f32 %v525_v12, %v524_v18 }
 0x1e4   : > { %697 = vpush %v526_v9 }
 0x215   : > { %s698_s21 = spop %697 }
 0x216   : > { %v529_v16 = vstv %s698_s21 }
 0x217   : > { %v530_v50 = vsub.f32 %v494_v35, %v529_v16  ;;  %536 = sbr.rel (%p674_p10) target bundleno = 548 (0x224), region = 36 }
 0x219   : > { %v531_v26 = vadd.f32 %v530_v50, %v528_v24 }
 0x21b   : > { %532 = vst [vmem:[#allocation2] sm:$0x1] %v531_v26 }
 0x222   : > { %v537_v10 = vld [vmem:[#allocation2] sm:$0x1] }
 0x223   : > { %538 = vst [vmem:[%s198_s4] sm:$0x1] %v537_v10 }
 0x224 PF: > { %s12_s15 = sadd.s32 1, %s829_s15   ;;  %s1112_s9 = smov %s817_s12 }
 0x225   : > { %p9_p11 = scmp.ge.s32.totalorder %s12_s15, 10   ;;  %s1113_s10 = smov %s821_s13 }
 0x226   : > { %s1114_s11 = smov %s825_s14  ;;  %s1115_s12 = smov %s1119_s16 }
 0x227   : > { %s1116_s13 = smov %s1123_s17  ;;  %s1117_s14 = smov %s1127_s18 }
 0x228   :  { %11 = sbr.rel (!%p9_p11) target bundleno = 4 (0x4), region = 66 }

// kernel: speed_estimator.3
= control target key start
LH: loop header
LB: loop body
LE: loop exit
PB: predicated region body
PF: predicated region fallthrough
CT: control target
= control target key end

     0   :  { %vm396_vm0 = vcmask 1024   ;;  %s913_s3 = inlined_call_operand.vmem [shape: f32[128,512], index: 3, kind: input, shape index: {}]   ;;  %s914_s0 = inlined_call_operand.vmem [shape: f32[2,2,128], index: 0, kind: input, shape index: {}]   ;;  %s915_s1 = inlined_call_operand.vmem [shape: f32[1,128], index: 1, kind: input, shape index: {}]   ;;  %s916_s2 = inlined_call_operand.vmem [shape: f32[1,128], index: 2, kind: input, shape index: {}]   ;;  %s917_s5 = inlined_call_operand.vmem [shape: f32[512,128], index: 5, kind: input, shape index: {}]   ;;  %s918_s6 = inlined_call_operand.vmem [shape: f32[1,128], index: 6, kind: input, shape index: {}]   ;;  %s919_s7 = inlined_call_operand.vmem [shape: f32[128,1], index: 7, kind: input, shape index: {}]   ;;  %s920_s4 = inlined_call_operand.vmem [shape: f32[1,512], index: 4, kind: input, shape index: {}]   ;;  %s921_s8 = inlined_call_operand.<no memory space> [shape: f32[1,1], index: 8, kind: input, shape index: {}]   ;;  %s922_s9 = inlined_call_operand.vmem [shape: f32[2,1], index: 9, kind: output, shape index: {}]  }
   0x1   :  { %v111_v0 = vld [vmem:[%s913_s3 + $0x1f0] sm:$0xff]  ;;  %v112_v2 = vld [vmem:[%s913_s3 + $0x1f8] sm:$0xff]  ;;  %v109_v6 = vld [vmem:[%s913_s3 + $0x1e0] sm:$0xff] }
   0x2   :  { %v107_v1 = vld [vmem:[%s913_s3 + $0x1d0] sm:$0xff]  ;;  %163 = vmatpush.msra.mxu2 %v111_v0  ;;  %183 = vmatpush.msra.mxu3 %v112_v2  ;;  %v108_v3 = vld [vmem:[%s913_s3 + $0x1d8] sm:$0xff]  ;;  %v105_v7 = vld [vmem:[%s913_s3 + $0x1c0] sm:$0xff] }
   0x3   :  { %v103_v4 = vld [vmem:[%s913_s3 + $0x1b0] sm:$0xff]  ;;  %v104_v5 = vld [vmem:[%s913_s3 + $0x1b8] sm:$0xff]  ;;  %v110_v8 = vld [vmem:[%s913_s3 + $0x1e8] sm:$0xff]  ;;  %123 = vmatpush.msra.mxu0 %v109_v6 }
   0x4   :  { %164 = vmatpush.msra.mxu2 %v107_v1  ;;  %184 = vmatpush.msra.mxu3 %v108_v3  ;;  %v99_v9 = vld [vmem:[%s913_s3 + $0x190] sm:$0xff]  ;;  %v100_v10 = vld [vmem:[%s913_s3 + $0x198] sm:$0xff]  ;;  %v101_v11 = vld [vmem:[%s913_s3 + $0x1a0] sm:$0xff] }
   0x5   :  { %143 = vmatpush.msra.mxu1 %v110_v8  ;;  %v106_v12 = vld [vmem:[%s913_s3 + $0x1c8] sm:$0xff]  ;;  %v95_v13 = vld [vmem:[%s913_s3 + $0x170] sm:$0xff]  ;;  %124 = vmatpush.msra.mxu0 %v105_v7  ;;  %v96_v14 = vld [vmem:[%s913_s3 + $0x178] sm:$0xff] }
   0x6   :  { %165 = vmatpush.msra.mxu2 %v103_v4  ;;  %185 = vmatpush.msra.mxu3 %v104_v5  ;;  %v102_v15 = vld [vmem:[%s913_s3 + $0x1a8] sm:$0xff]  ;;  %v97_v16 = vld [vmem:[%s913_s3 + $0x180] sm:$0xff]  ;;  %v91_v18 = vld [vmem:[%s913_s3 + $0x150] sm:$0xff] }
   0x7   :  { %144 = vmatpush.msra.mxu1 %v106_v12  ;;  %v98_v17 = vld [vmem:[%s913_s3 + $0x188] sm:$0xff]  ;;  %125 = vmatpush.msra.mxu0 %v101_v11  ;;  %v92_v19 = vld [vmem:[%s913_s3 + $0x158] sm:$0xff]  ;;  %v93_v20 = vld [vmem:[%s913_s3 + $0x160] sm:$0xff] }
   0x8   :  { %166 = vmatpush.msra.mxu2 %v99_v9  ;;  %186 = vmatpush.msra.mxu3 %v100_v10  ;;  %v94_v21 = vld [vmem:[%s913_s3 + $0x168] sm:$0xff]  ;;  %v87_v22 = vld [vmem:[%s913_s3 + $0x130] sm:$0xff]  ;;  %v88_v23 = vld [vmem:[%s913_s3 + $0x138] sm:$0xff] }
   0x9   :  { %145 = vmatpush.msra.mxu1 %v102_v15  ;;  %126 = vmatpush.msra.mxu0 %v97_v16  ;;  %v89_v24 = vld [vmem:[%s913_s3 + $0x140] sm:$0xff]  ;;  %v90_v25 = vld [vmem:[%s913_s3 + $0x148] sm:$0xff]  ;;  %v83_v26 = vld [vmem:[%s913_s3 + $0x110] sm:$0xff] }
   0xa   :  { %167 = vmatpush.msra.mxu2 %v95_v13  ;;  %187 = vmatpush.msra.mxu3 %v96_v14  ;;  %v84_v27 = vld [vmem:[%s913_s3 + $0x118] sm:$0xff]  ;;  %v85_v28 = vld [vmem:[%s913_s3 + $0x120] sm:$0xff]  ;;  %v86_v29 = vld [vmem:[%s913_s3 + $0x128] sm:$0xff] }
   0xb   :  { %146 = vmatpush.msra.mxu1 %v98_v17  ;;  %127 = vmatpush.msra.mxu0 %v93_v20  ;;  %v79_v30 = vld [vmem:[%s913_s3 + $0xf0] sm:$0xff]  ;;  %v80_v31 = vld [vmem:[%s913_s3 + $0xf8] sm:$0xff]  ;;  %v81_v32 = vld [vmem:[%s913_s3 + $0x100] sm:$0xff] }
   0xc   :  { %168 = vmatpush.msra.mxu2 %v91_v18  ;;  %188 = vmatpush.msra.mxu3 %v92_v19  ;;  %v82_v33 = vld [vmem:[%s913_s3 + $0x108] sm:$0xff]  ;;  %v75_v34 = vld [vmem:[%s913_s3 + $0xd0] sm:$0xff]  ;;  %v76_v36 = vld [vmem:[%s913_s3 + $0xd8] sm:$0xff] }
   0xd   :  { %147 = vmatpush.msra.mxu1 %v94_v21  ;;  %128 = vmatpush.msra.mxu0 %v89_v24  ;;  %v71_v35 = vld [vmem:[%s913_s3 + $0xb0] sm:$0xff]  ;;  %v72_v37 = vld [vmem:[%s913_s3 + $0xb8] sm:$0xff]  ;;  %v77_v38 = vld [vmem:[%s913_s3 + $0xe0] sm:$0xff] }
   0xe   :  { %169 = vmatpush.msra.mxu2 %v87_v22  ;;  %189 = vmatpush.msra.mxu3 %v88_v23  ;;  %v78_v39 = vld [vmem:[%s913_s3 + $0xe8] sm:$0xff]  ;;  %v34_v40 = vld [vmem:[%s914_s0] sm:$0x3]  ;;  %v402_v41 = vld [vmem:[%s914_s0 + $0x2] sm:$0x3] }
   0xf   :  { %148 = vmatpush.msra.mxu1 %v90_v25  ;;  %129 = vmatpush.msra.mxu0 %v85_v28  ;;  %v73_v42 = vld [vmem:[%s913_s3 + $0xc0] sm:$0xff]  ;;  %v74_v43 = vld [vmem:[%s913_s3 + $0xc8] sm:$0xff]  ;;  %v37_v44 = vadd.f32 %v402_v41, %v34_v40  ;;  %v67_v45 = vld [vmem:[%s913_s3 + $0x90] sm:$0xff] }
  0x10   :  { %170 = vmatpush.msra.mxu2 %v83_v26  ;;  %190 = vmatpush.msra.mxu3 %v84_v27  ;;  %v68_v46 = vld [vmem:[%s913_s3 + $0x98] sm:$0xff]  ;;  %v403_v47 = vld [vmem:[%s915_s1] ss:$0 sm:$0xff]  ;;  %v70_v49 = vld [vmem:[%s913_s3 + $0xa8] sm:$0xff] }
  0x11   :  { %149 = vmatpush.msra.mxu1 %v86_v29  ;;  %130 = vmatpush.msra.mxu0 %v81_v32  ;;  %v69_v48 = vld [vmem:[%s913_s3 + $0xa0] sm:$0xff]  ;;  %v38_v50 = vmul.f32 0.00390625, %v37_v44  ;;  %v63_v51 = vld [vmem:[%s913_s3 + $0x70] sm:$0xff]  ;;  %v64_v52 = vld [vmem:[%s913_s3 + $0x78] sm:$0xff] }
  0x12   :  { %171 = vmatpush.msra.mxu2 %v79_v30  ;;  %191 = vmatpush.msra.mxu3 %v80_v31  ;;  %v65_v53 = vld [vmem:[%s913_s3 + $0x80] sm:$0xff]  ;;  %v66_v54 = vld [vmem:[%s913_s3 + $0x88] sm:$0xff]  ;;  %v59_v55 = vld [vmem:[%s913_s3 + $0x50] sm:$0xff] }
  0x13   :  { %150 = vmatpush.msra.mxu1 %v82_v33  ;;  %131 = vmatpush.msra.mxu0 %v77_v38  ;;  %v60_v56 = vld [vmem:[%s913_s3 + $0x58] sm:$0xff]  ;;  %v43_v57 = vmul.f32 %v403_v47, %v38_v50  ;;  %v404_v58 = vld [vmem:[%s916_s2] ss:$0 sm:$0xff]  ;;  %v62_v60 = vld [vmem:[%s913_s3 + $0x68] sm:$0xff] }
  0x14   :  { %172 = vmatpush.msra.mxu2 %v75_v34  ;;  %192 = vmatpush.msra.mxu3 %v76_v36  ;;  %v61_v59 = vld [vmem:[%s913_s3 + $0x60] sm:$0xff]  ;;  %v55_v61 = vld [vmem:[%s913_s3 + $0x30] sm:$0xff]  ;;  %v56_v62 = vld [vmem:[%s913_s3 + $0x38] sm:$0xff] }
  0x15   :  { %151 = vmatpush.msra.mxu1 %v78_v39  ;;  %132 = vmatpush.msra.mxu0 %v73_v42  ;;  %v57_v63 = vld [vmem:[%s913_s3 + $0x40] sm:$0xff]  ;;  %v58_v0 = vld [vmem:[%s913_s3 + $0x48] sm:$0xff]  ;;  %v51_v1 = vld [vmem:[%s913_s3 + $0x10] sm:$0xff]  ;;  %v48_v2 = vadd.f32 %v404_v58, %v43_v57 }
  0x16   :  { %173 = vmatpush.msra.mxu2 %v71_v35  ;;  %193 = vmatpush.msra.mxu3 %v72_v37  ;;  %v52_v3 = vld [vmem:[%s913_s3 + $0x18] sm:$0xff]  ;;  %v53_v4 = vld [vmem:[%s913_s3 + $0x20] sm:$0xff]  ;;  %v54_v5 = vld [vmem:[%s913_s3 + $0x28] sm:$0xff] }
  0x17   :  { %152 = vmatpush.msra.mxu1 %v74_v43  ;;  %133 = vmatpush.msra.mxu0 %v69_v48  ;;  %v254_v6 = vld [vmem:[%s917_s5 + $0x178] sm:$0xff]  ;;  %v49_v8 = vld [vmem:[%s913_s3] sm:$0xff]  ;;  %v50_v9 = vld [vmem:[%s913_s3 + $0x8] sm:$0xff] }
  0x18   :  { %174 = vmatpush.msra.mxu2 %v67_v45  ;;  %194 = vmatpush.msra.mxu3 %v68_v46  ;;  %v270_v7 = vld [vmem:[%s917_s5 + $0x1f8] sm:$0xff]  ;;  %v253_v11 = vld [vmem:[%s917_s5 + $0x170] sm:$0xff]  ;;  %v252_v15 = vld [vmem:[%s917_s5 + $0x168] sm:$0xff] }
  0x19   :  { %153 = vmatpush.msra.mxu1 %v70_v49  ;;  %134 = vmatpush.msra.mxu0 %v65_v53  ;;  %v222_v10 = vld [vmem:[%s917_s5 + $0x78] sm:$0xff]  ;;  %v269_v13 = vld [vmem:[%s917_s5 + $0x1f0] sm:$0xff]  ;;  %v268_v17 = vld [vmem:[%s917_s5 + $0x1e8] sm:$0xff] }
  0x1a   :  { %175 = vmatpush.msra.mxu2 %v63_v51  ;;  %195 = vmatpush.msra.mxu3 %v64_v52  ;;  %v238_v12 = vld [vmem:[%s917_s5 + $0xf8] sm:$0xff]  ;;  %v221_v14 = vld [vmem:[%s917_s5 + $0x70] sm:$0xff]  ;;  %v220_v18 = vld [vmem:[%s917_s5 + $0x68] sm:$0xff] }
  0x1b   :  { %154 = vmatpush.msra.mxu1 %v66_v54  ;;  %135 = vmatpush.msra.mxu0 %v61_v59  ;;  %v237_v16 = vld [vmem:[%s917_s5 + $0xf0] sm:$0xff]  ;;  %v251_v19 = vld [vmem:[%s917_s5 + $0x160] sm:$0xff]  ;;  %v236_v20 = vld [vmem:[%s917_s5 + $0xe8] sm:$0xff] }
  0x1c   :  { %176 = vmatpush.msra.mxu2 %v59_v55  ;;  %196 = vmatpush.msra.mxu3 %v60_v56  ;;  %v267_v21 = vld [vmem:[%s917_s5 + $0x1e0] sm:$0xff]  ;;  %v250_v23 = vld [vmem:[%s917_s5 + $0x158] sm:$0xff]  ;;  %v249_v27 = vld [vmem:[%s917_s5 + $0x150] sm:$0xff] }
  0x1d   :  { %155 = vmatpush.msra.mxu1 %v62_v60  ;;  %136 = vmatpush.msra.mxu0 %v57_v63  ;;  %v219_v22 = vld [vmem:[%s917_s5 + $0x60] sm:$0xff]  ;;  %v266_v25 = vld [vmem:[%s917_s5 + $0x1d8] sm:$0xff]  ;;  %v265_v29 = vld [vmem:[%s917_s5 + $0x1d0] sm:$0xff] }
  0x1e   :  { %177 = vmatpush.msra.mxu2 %v55_v61  ;;  %197 = vmatpush.msra.mxu3 %v56_v62  ;;  %v235_v24 = vld [vmem:[%s917_s5 + $0xe0] sm:$0xff]  ;;  %v218_v26 = vld [vmem:[%s917_s5 + $0x58] sm:$0xff]  ;;  %v217_v30 = vld [vmem:[%s917_s5 + $0x50] sm:$0xff] }
  0x1f   :  { %156 = vmatpush.msra.mxu1 %v58_v0  ;;  %137 = vmatpush.msra.mxu0 %v53_v4  ;;  %v234_v28 = vld [vmem:[%s917_s5 + $0xd8] sm:$0xff]  ;;  %v248_v31 = vld [vmem:[%s917_s5 + $0x148] sm:$0xff]  ;;  %v233_v32 = vld [vmem:[%s917_s5 + $0xd0] sm:$0xff] }
  0x20   :  { %178 = vmatpush.msra.mxu2 %v51_v1  ;;  %198 = vmatpush.msra.mxu3 %v52_v3  ;;  %v264_v33 = vld [vmem:[%s917_s5 + $0x1c8] sm:$0xff]  ;;  %v247_v35 = vld [vmem:[%s917_s5 + $0x140] sm:$0xff]  ;;  %v246_v39 = vld [vmem:[%s917_s5 + $0x138] sm:$0xff] }
  0x21   :  { %179 = vmatmul.f32.vlgmr.msra.gmra.mxu2 %v48_v2  ;;  %199 = vmatmul.f32.vlgmr.msra.gmra.mxu3 %v48_v2  ;;  %v216_v34 = vld [vmem:[%s917_s5 + $0x48] sm:$0xff]  ;;  %v263_v37 = vld [vmem:[%s917_s5 + $0x1c0] sm:$0xff]  ;;  %v262_v41 = vld [vmem:[%s917_s5 + $0x1b8] sm:$0xff] }
  0x22   :  { %157 = vmatpush.msra.mxu1 %v54_v5  ;;  %315 = vmatpush.msrb.mxu2 %v254_v6  ;;  %v232_v36 = vld [vmem:[%s917_s5 + $0xc8] sm:$0xff]  ;;  %v215_v38 = vld [vmem:[%s917_s5 + $0x40] sm:$0xff]  ;;  %v214_v42 = vld [vmem:[%s917_s5 + $0x38] sm:$0xff] }
  0x23   :  { %335 = vmatpush.msrb.mxu3 %v270_v7  ;;  %138 = vmatpush.msra.mxu0 %v49_v8  ;;  %v231_v40 = vld [vmem:[%s917_s5 + $0xc0] sm:$0xff]  ;;  %v245_v43 = vld [vmem:[%s917_s5 + $0x130] sm:$0xff]  ;;  %v230_v44 = vld [vmem:[%s917_s5 + $0xb8] sm:$0xff] }
  0x24   :  { %158 = vmatpush.msra.mxu1 %v50_v9  ;;  %139 = vmatmul.f32.vlgmr.msra.gmra.mxu0 %v48_v2  ;;  %v261_v45 = vld [vmem:[%s917_s5 + $0x1b0] sm:$0xff]  ;;  %v244_v47 = vld [vmem:[%s917_s5 + $0x128] sm:$0xff]  ;;  %v243_v51 = vld [vmem:[%s917_s5 + $0x120] sm:$0xff] }
  0x25   :  { %159 = vmatmul.f32.vlgmr.msra.gmra.mxu1 %v48_v2  ;;  %275 = vmatpush.msrb.mxu0 %v222_v10  ;;  %v213_v46 = vld [vmem:[%s917_s5 + $0x30] sm:$0xff]  ;;  %v260_v49 = vld [vmem:[%s917_s5 + $0x1a8] sm:$0xff]  ;;  %v259_v53 = vld [vmem:[%s917_s5 + $0x1a0] sm:$0xff] }
  0x26   :  { %316 = vmatpush.msrb.mxu2 %v253_v11  ;;  %295 = vmatpush.msrb.mxu1 %v238_v12  ;;  %v229_v48 = vld [vmem:[%s917_s5 + $0xb0] sm:$0xff]  ;;  %v212_v50 = vld [vmem:[%s917_s5 + $0x28] sm:$0xff]  ;;  %v211_v54 = vld [vmem:[%s917_s5 + $0x20] sm:$0xff] }
  0x27   :  { %336 = vmatpush.msrb.mxu3 %v269_v13  ;;  %276 = vmatpush.msrb.mxu0 %v221_v14  ;;  %v228_v52 = vld [vmem:[%s917_s5 + $0xa8] sm:$0xff]  ;;  %v242_v55 = vld [vmem:[%s917_s5 + $0x118] sm:$0xff]  ;;  %v227_v57 = vld [vmem:[%s917_s5 + $0xa0] sm:$0xff] }
  0x28   :  { %317 = vmatpush.msrb.mxu2 %v252_v15  ;;  %296 = vmatpush.msrb.mxu1 %v237_v16  ;;  %v210_v56 = vld [vmem:[%s917_s5 + $0x18] sm:$0xff]  ;;  %v241_v58 = vld [vmem:[%s917_s5 + $0x110] sm:$0xff]  ;;  %v240_v62 = vld [vmem:[%s917_s5 + $0x108] sm:$0xff] }
  0x29   :  { %337 = vmatpush.msrb.mxu3 %v268_v17  ;;  %277 = vmatpush.msrb.mxu0 %v220_v18  ;;  %v258_v59 = vld [vmem:[%s917_s5 + $0x198] sm:$0xff]  ;;  %v209_v60 = vld [vmem:[%s917_s5 + $0x10] sm:$0xff]  ;;  %v208_v0 = vld [vmem:[%s917_s5 + $0x8] sm:$0xff] }
  0x2a   :  { %318 = vmatpush.msrb.mxu2 %v251_v19  ;;  %297 = vmatpush.msrb.mxu1 %v236_v20  ;;  %v226_v61 = vld [vmem:[%s917_s5 + $0x98] sm:$0xff]  ;;  %v257_v63 = vld [vmem:[%s917_s5 + $0x190] sm:$0xff]  ;;  %v239_v2 = vld [vmem:[%s917_s5 + $0x100] sm:$0xff] }
  0x2b   :  { %338 = vmatpush.msrb.mxu3 %v267_v21  ;;  %278 = vmatpush.msrb.mxu0 %v219_v22  ;;  %v225_v1 = vld [vmem:[%s917_s5 + $0x90] sm:$0xff]  ;;  %v256_v3 = vld [vmem:[%s917_s5 + $0x188] sm:$0xff]  ;;  %v207_v4 = vld [vmem:[%s917_s5] sm:$0xff] }
  0x2c   :  { %319 = vmatpush.msrb.mxu2 %v250_v23  ;;  %298 = vmatpush.msrb.mxu1 %v235_v24  ;;  %v224_v5 = vld [vmem:[%s917_s5 + $0x88] sm:$0xff]  ;;  %v255_v6 = vld [vmem:[%s917_s5 + $0x180] sm:$0xff]  ;;  %v371_v8 = vld [vmem:[%s919_s7 + $0x78] sm:$0xff] }
  0x2d   :  { %339 = vmatpush.msrb.mxu3 %v266_v25  ;;  %279 = vmatpush.msrb.mxu0 %v218_v26  ;;  %v223_v7 = vld [vmem:[%s917_s5 + $0x80] sm:$0xff]  ;;  %v370_v9 = vld [vmem:[%s919_s7 + $0x70] sm:$0xff]  ;;  %v369_v10 = vld [vmem:[%s919_s7 + $0x68] sm:$0xff] }
  0x2e   :  { %320 = vmatpush.msrb.mxu2 %v249_v27  ;;  %299 = vmatpush.msrb.mxu1 %v234_v28  ;;  %v368_v11 = vld [vmem:[%s919_s7 + $0x60] sm:$0xff]  ;;  %v367_v12 = vld [vmem:[%s919_s7 + $0x58] sm:$0xff]  ;;  %v366_v13 = vld [vmem:[%s919_s7 + $0x50] sm:$0xff] }
  0x2f   :  { %340 = vmatpush.msrb.mxu3 %v265_v29  ;;  %280 = vmatpush.msrb.mxu0 %v217_v30  ;;  %v365_v14 = vld [vmem:[%s919_s7 + $0x48] sm:$0xff]  ;;  %v364_v15 = vld [vmem:[%s919_s7 + $0x40] sm:$0xff]  ;;  %v363_v16 = vld [vmem:[%s919_s7 + $0x38] sm:$0xff] }
  0x30   :  { %321 = vmatpush.msrb.mxu2 %v248_v31  ;;  %300 = vmatpush.msrb.mxu1 %v233_v32  ;;  %v362_v17 = vld [vmem:[%s919_s7 + $0x30] sm:$0xff]  ;;  %v113_v18 = vld [vmem:[%s920_s4] sm:$0xf] }
  0x31   :  { %341 = vmatpush.msrb.mxu3 %v264_v33  ;;  %281 = vmatpush.msrb.mxu0 %v216_v34  ;;  %v115_v19 = vperm.slane %v113_v18, 0  ;;  %v116_v20 = vperm.slane %v113_v18, 1  ;;  %v117_v21 = vperm.slane %v113_v18, 2  ;;  %v118_v22 = vperm.slane %v113_v18, 3 }
  0x32   :  { %322 = vmatpush.msrb.mxu2 %v247_v35  ;;  %301 = vmatpush.msrb.mxu1 %v232_v36  ;;  %v361_v35 = vld [vmem:[%s919_s7 + $0x28] sm:$0xff]  ;;  %v360_v36 = vld [vmem:[%s919_s7 + $0x20] sm:$0xff] }
  0x33   :  { %342 = vmatpush.msrb.mxu3 %v263_v37  ;;  %282 = vmatpush.msrb.mxu0 %v215_v38  ;;  %v359_v37 = vld [vmem:[%s919_s7 + $0x18] sm:$0xff]  ;;  %v358_v38 = vld [vmem:[%s919_s7 + $0x10] sm:$0xff] }
  0x34   :  { %323 = vmatpush.msrb.mxu2 %v246_v39  ;;  %302 = vmatpush.msrb.mxu1 %v231_v40  ;;  %v357_v39 = vld [vmem:[%s919_s7 + $0x8] sm:$0xff]  ;;  %v356_v40 = vld [vmem:[%s919_s7] sm:$0xff] }
  0x35   :  { %343 = vmatpush.msrb.mxu3 %v262_v41  ;;  %283 = vmatpush.msrb.mxu0 %v214_v42  ;;  %v14_v41 = vstv %s921_s8  ;;  %v405_v42 = vld [vmem:[%s918_s6] ss:$0 sm:$0xff] }
  0x36   :  { %324 = vmatpush.msrb.mxu2 %v245_v43  ;;  %303 = vmatpush.msrb.mxu1 %v230_v44  ;;  %15 = vst [vmem:[#allocation2] sm:$0x1] %v14_v41 }
  0x37   :  { %344 = vmatpush.msrb.mxu3 %v261_v45  ;;  %284 = vmatpush.msrb.mxu0 %v213_v46 }
  0x38   :  { %325 = vmatpush.msrb.mxu2 %v244_v47  ;;  %304 = vmatpush.msrb.mxu1 %v229_v48 }
  0x39   :  { %345 = vmatpush.msrb.mxu3 %v260_v49  ;;  %285 = vmatpush.msrb.mxu0 %v212_v50 }
  0x3a   :  { %326 = vmatpush.msrb.mxu2 %v243_v51  ;;  %305 = vmatpush.msrb.mxu1 %v228_v52 }
  0x3b   :  { %346 = vmatpush.msrb.mxu3 %v259_v53  ;;  %286 = vmatpush.msrb.mxu0 %v211_v54 }
  0x3c   :  { %327 = vmatpush.msrb.mxu2 %v242_v55  ;;  %306 = vmatpush.msrb.mxu1 %v227_v57 }
  0x3d   :  { %287 = vmatpush.msrb.mxu0 %v210_v56  ;;  %347 = vmatpush.msrb.mxu3 %v258_v59  ;;  %v406_v52 = vld [vmem:[#allocation2] ss:$0 sm:$0xff] }
  0x3e   :  { %328 = vmatpush.msrb.mxu2 %v241_v58  ;;  %307 = vmatpush.msrb.mxu1 %v226_v61 }
  0x3f   :  { %288 = vmatpush.msrb.mxu0 %v209_v60  ;;  %348 = vmatpush.msrb.mxu3 %v257_v63 }
  0x40   :  { %329 = vmatpush.msrb.mxu2 %v240_v62  ;;  %308 = vmatpush.msrb.mxu1 %v225_v1 }
  0x41   :  { %289 = vmatpush.msrb.mxu0 %v208_v0  ;;  %349 = vmatpush.msrb.mxu3 %v256_v3 }
  0x42   :  { %330 = vmatpush.msrb.mxu2 %v239_v2  ;;  %309 = vmatpush.msrb.mxu1 %v224_v5 }
  0x43   :  { %290 = vmatpush.msrb.mxu0 %v207_v4  ;;  %350 = vmatpush.msrb.mxu3 %v255_v6 }
  0x44   :  { %310 = vmatpush.msrb.mxu1 %v223_v7 }
  0x45   :  { %376 = vmatpush.msra.mxu0 %v371_v8 }
  0x47   :  { %377 = vmatpush.msra.mxu0 %v370_v9 }
  0x49   :  { %378 = vmatpush.msra.mxu0 %v369_v10 }
  0x4b   :  { %379 = vmatpush.msra.mxu0 %v368_v11 }
  0x4d   :  { %380 = vmatpush.msra.mxu0 %v367_v12 }
  0x4f   :  { %381 = vmatpush.msra.mxu0 %v366_v13 }
  0x51   :  { %382 = vmatpush.msra.mxu0 %v365_v14 }
  0x53   :  { %383 = vmatpush.msra.mxu0 %v364_v15 }
  0x55   :  { %384 = vmatpush.msra.mxu0 %v363_v16 }
  0x57   :  { %385 = vmatpush.msra.mxu0 %v362_v17 }
  0x59   :  { %386 = vmatpush.msra.mxu0 %v361_v35 }
  0x5b   :  { %387 = vmatpush.msra.mxu0 %v360_v36 }
  0x5d   :  { %388 = vmatpush.msra.mxu0 %v359_v37 }
  0x5f   :  { %389 = vmatpush.msra.mxu0 %v358_v38 }
  0x61   :  { %390 = vmatpush.msra.mxu0 %v357_v39 }
  0x63   :  { %391 = vmatpush.msra.mxu0 %v356_v40 }
  0xa1   :  { %v140_v23 = vpop.f32.mrf.mxu0 }
  0xa2   :  { %v160_v24 = vpop.f32.mrf.mxu1  ;;  %v141_v25 = vadd.f32 %v140_v23, %v115_v19 }
  0xa3   :  { %v161_v26 = vadd.f32 %v160_v24, %v116_v20 }
  0xa4   :  { %v180_v27 = vpop.f32.mrf.mxu2  ;;  %v200_v28 = vpop.f32.mrf.mxu3  ;;  %v203_v30 = vmax.f32 %v141_v25, 0.0 }
  0xa5   :  { %v181_v29 = vadd.f32 %v180_v27, %v117_v21  ;;  %v201_v31 = vadd.f32 %v200_v28, %v118_v22  ;;  %v204_v32 = vmax.f32 %v161_v26, 0.0 }
  0xa6   :  { %291 = vmatmul.f32.vlgmr.msrb.gmra.mxu0 %v203_v30 }
  0xa7   :  { %v205_v33 = vmax.f32 %v181_v29, 0.0  ;;  %v206_v34 = vmax.f32 %v201_v31, 0.0  ;;  %311 = vmatmul.f32.vlgmr.msrb.gmra.mxu1 %v204_v32 }
  0xa9   :  { %331 = vmatmul.f32.vlgmr.msrb.gmra.mxu2 %v205_v33  ;;  %351 = vmatmul.f32.vlgmr.msrb.gmra.mxu3 %v206_v34 }
 0x123   :  { %v292_v43 = vpop.f32.mrf.mxu0 }
 0x124   :  { %v293_v44 = vadd.f32 %v405_v42, %v292_v43  ;;  %v312_v45 = vpop.f32.mrf.mxu1 }
 0x126   :  { %v313_v46 = vadd.f32 %v312_v45, %v293_v44 }
 0x12c   :  { %v332_v47 = vpop.f32.mrf.mxu2  ;;  %v352_v48 = vpop.f32.mrf.mxu3 }
 0x12d   :  { %v333_v49 = vadd.f32 %v332_v47, %v313_v46 }
 0x12f   :  { %v353_v50 = vadd.f32 %v352_v48, %v333_v49 }
 0x131   :  { %v355_v51 = vmax.f32 %v353_v50, 0.0 }
 0x133   :  { %392 = vmatmul.f32.vlgmr.msra.gmra.mxu0 %v355_v51 }
 0x1b0   :  { %v393_v53 = vpop.f32.mrf.mxu0 }
 0x1b1   :  { %v394_v54 = vadd.f32 %v406_v52, %v393_v53 }
 0x1b3   :  { %397 = vst.msk [vmem:[%s922_s9] sm:$0x3] %vm396_vm0, %v394_v54 }

</bundles_post_ra>
